<compile_context>
chip_gen: v7x
topology: tpu7x:2x2x1
jax: 0.10.0
libtpu: 0.0.40
codegen_flags: <defaults>
</compile_context>

<pallas_src>
import functools

import jax
import jax.numpy as jnp
from jax.experimental import pallas as pl
from jax.experimental.pallas import tpu as pltpu


def _qmix_kernel(
    qsT_ref,    # (M_pad, TB)      agent qs, batch on lanes (zero-padded agents)
    stT_ref,    # (D, TB)          state, batch on lanes
    wcat_ref,   # (MH + 3H, D)     fused hyper weights (w1 | b1 | w2 | b2a)
    bcat_ref,   # (MH + 3H, 1)     fused hyper biases
    eT_ref,     # (MH, M_pad)      expansion matrix: row i -> agent i // H
    sT_ref,     # (H, MH)          segment-sum over agents (block identity)
    b2w_ref,    # (H, 1)           hyper_b2 second-layer weight
    b2bb_ref,   # (1, 1)           hyper_b2 second-layer bias
    out_ref,    # (1, 1, TB)       q_tot, lane-dense row
    *,
    n_agents: int,
    hidden_dim: int,
):
    M, H = n_agents, hidden_dim
    MH = M * H

    stT = stT_ref[...]                                   # (D, TB) f32
    qsT = qsT_ref[...]                                   # (M_pad, TB) f32

    # All four state-conditioned linears in one MXU pass.
    fused = (
        jnp.dot(wcat_ref[...], stT, preferred_element_type=jnp.float32)
        + bcat_ref[...]                                  # (MH+3H, 1) lane-broadcast
    )                                                    # (MH+3H, TB)

    w1 = jnp.abs(fused[:MH, :])                          # (MH, TB)
    b1 = fused[MH:MH + H, :]                             # (H, TB)
    w2 = jnp.abs(fused[MH + H:MH + 2 * H, :])            # (H, TB)
    tpre = fused[MH + 2 * H:MH + 3 * H, :]               # (H, TB)
    t = jnp.where(tpre > 0, tpre, 0.01 * tpre)           # LeakyReLU(0.01)

    # Agent contraction on the MXU:
    #   qs_exp[i, b] = qs[i // H, b]
    #   acc[j, b]    = b1[j, b] + sum_m qs[m, b] * w1[m*H + j, b]
    qs_exp = jnp.dot(eT_ref[...], qsT, preferred_element_type=jnp.float32)   # (MH, TB)
    acc = b1 + jnp.dot(sT_ref[...], qs_exp * w1,
                       preferred_element_type=jnp.float32)                    # (H, TB)

    # ELU (alpha=1); clamp before exp so the untaken branch cannot overflow.
    h = jnp.where(acc > 0, acc, jnp.exp(jnp.minimum(acc, 0.0)) - 1.0)

    # q_tot = sum_j h*w2  +  t @ b2w  +  b2bb, as one elementwise mul + sublane reduce.
    z = h * w2 + t * b2w_ref[...]                        # (H, TB)
    q_row = jnp.sum(z, axis=0, keepdims=True) + b2bb_ref[...]                 # (1, TB)
    out_ref[0] = q_row


def qmixer_forward(agent_qs, state, params, *, n_agents, input_dim, hidden_dim,
                   tile_b=256, compute_dtype=jnp.float32):
    """agent_qs: [N, L, M, 1], state: [N, L, D]  ->  q_tot: [N, L, 1].

    compute_dtype=jnp.bfloat16 halves the HBM stream on v6e/v7x (accumulation
    stays f32 inside the kernel); keep f32 on v5e.
    """
    N, L, M, A = agent_qs.shape
    assert M == n_agents and A == 1
    assert tile_b % 128 == 0, "tile_b must be lane-dense (multiple of 128)"
    D, H = input_dim, hidden_dim
    MH = M * H

    B = N * L
    G = pl.cdiv(B, tile_b)
    B_pad = G * tile_b
    M_pad = ((M + 7) // 8) * 8          # pad agent axis to a multiple of 8

    qs2d = agent_qs.reshape(B, M)
    st2d = state.reshape(B, D)
    qs2d = jnp.pad(qs2d, ((0, B_pad - B), (0, M_pad - M)))
    st2d = jnp.pad(st2d, ((0, B_pad - B), (0, 0)))

    # Lane-dense layout: batch on the last (lane) dimension.
    qsT = qs2d.T.astype(compute_dtype)                   # (M_pad, B_pad)
    stT = st2d.T.astype(compute_dtype)                   # (D, B_pad)

    (w1w, w1b, b1w, b1b, w2w, w2b, b2aw, b2ab, b2bw, b2bb) = params

    # Fuse the four shared-LHS hyper linears: fused = Wcat @ st.T + bcat.
    wcatT = jnp.concatenate([w1w.T, b1w.T, w2w.T, b2aw.T],
                            axis=0).astype(compute_dtype)        # (MH+3H, D)
    bcat = jnp.concatenate([w1b, b1b, w2b, b2ab],
                           axis=1).T.astype(jnp.float32)         # (MH+3H, 1)

    # Constant expansion / segment-sum matrices for the agent contraction.
    eT = jnp.kron(jnp.eye(M, dtype=jnp.float32),
                  jnp.ones((H, 1), jnp.float32))                 # (MH, M)
    eT = jnp.pad(eT, ((0, 0), (0, M_pad - M)))                   # (MH, M_pad)
    sT = jnp.kron(jnp.ones((1, M), jnp.float32),
                  jnp.eye(H, dtype=jnp.float32))                 # (H, MH)

    b2w = b2bw.astype(jnp.float32)                               # (H, 1)
    b2b = b2bb.astype(jnp.float32)                               # (1, 1)

    kernel = functools.partial(_qmix_kernel, n_agents=M, hidden_dim=H)

    def inv(shape):        # grid-invariant (weight) input
        return pl.BlockSpec(shape, lambda i: (0, 0))

    elt = jnp.dtype(compute_dtype).itemsize
    cost = pl.CostEstimate(
        flops=2 * B_pad * (D * (MH + 3 * H) + M_pad * MH + MH * H),
        transcendentals=B_pad * H,
        bytes_accessed=(B_pad * (D + M_pad) * elt + B_pad * 4
                        + ((MH + 3 * H) * (D + 1) + MH * M_pad + H * MH + H + 1) * 4),
    )

    out = pl.pallas_call(
        kernel,
        out_shape=jax.ShapeDtypeStruct((G, 1, tile_b), jnp.float32),
        grid_spec=pltpu.PrefetchScalarGridSpec(
            num_scalar_prefetch=0,
            grid=(G,),
            in_specs=[
                pl.BlockSpec((M_pad, tile_b), lambda i: (0, i)),   # agent qs (T)
                pl.BlockSpec((D, tile_b), lambda i: (0, i)),       # state (T)
                inv((MH + 3 * H, D)),                              # fused weights
                inv((MH + 3 * H, 1)),                              # fused biases
                inv((MH, M_pad)),                                  # expansion E
                inv((H, MH)),                                      # segment-sum S
                inv((H, 1)),                                       # hyper_b2[2] W
                inv((1, 1)),                                       # hyper_b2[2] b
            ],
            out_specs=pl.BlockSpec((1, 1, tile_b), lambda i: (i, 0, 0)),
        ),
        compiler_params=pltpu.CompilerParams(
            dimension_semantics=("parallel",),
            vmem_limit_bytes=32 * 1024 * 1024,
        ),
        cost_estimate=cost,
    )(qsT, stT, wcatT, bcat, eT, sT, b2w, b2b)

    return out.reshape(B_pad)[:B].reshape(N, L, 1)


def init_params(key, n_agents, input_dim, hidden_dim):
    """Deterministic synthetic init; weights stored as (in, out)."""
    D, H, M = input_dim, hidden_dim, n_agents
    ks = jax.random.split(key, 10)

    def w(k, shape, scale=0.1):
        return (scale * jax.random.normal(k, shape)).astype(jnp.float32)

    return (
        w(ks[0], (D, M * H)), w(ks[1], (1, M * H)),   # hyper_w1
        w(ks[2], (D, H)),     w(ks[3], (1, H)),       # hyper_b1
        w(ks[4], (D, H)),     w(ks[5], (1, H)),       # hyper_w2
        w(ks[6], (D, H)),     w(ks[7], (1, H)),       # hyper_b2 layer 0
        w(ks[8], (H, 1)),     w(ks[9], (1, 1)),       # hyper_b2 layer 2
    )


def _reference(agent_qs, state, params, n_agents, hidden_dim):
    """Pure-JAX reference mirroring the PyTorch forward."""
    (w1w, w1b, b1w, b1b, w2w, w2b, b2aw, b2ab, b2bw, b2bb) = params
    N, L, M, A = agent_qs.shape
    B = N * L
    qs = agent_qs.reshape(B, 1, M * A)
    st = state.reshape(B, -1)
    w1 = jnp.abs(st @ w1w + w1b).reshape(B, n_agents, hidden_dim)
    b1 = (st @ b1w + b1b)[:, None, :]
    w2 = jnp.abs(st @ w2w + w2b)[:, :, None]
    t = st @ b2aw + b2ab
    t = jnp.where(t > 0, t, 0.01 * t)
    b2 = (t @ b2bw + b2bb)[:, None, :]
    pre = jnp.einsum("bij,bjk->bik", qs, w1) + b1
    h = jnp.where(pre > 0, pre, jnp.exp(jnp.minimum(pre, 0.0)) - 1.0)
    q_tot = jnp.einsum("bij,bjk->bik", h, w2) + b2
    return q_tot.reshape(N, L, 1)


if __name__ == "__main__":
    N, L = 2, 8            # batch dims -> B = 16 (padded to one 256-wide tile)
    n_agents = 4
    input_dim = 32
    hidden_dim = 32

    key = jax.random.PRNGKey(0)
    k_qs, k_st, k_p = jax.random.split(key, 3)
    agent_qs = jax.random.normal(k_qs, (N, L, n_agents, 1), dtype=jnp.float32)
    state = jax.random.normal(k_st, (N, L, input_dim), dtype=jnp.float32)
    params = init_params(k_p, n_agents, input_dim, hidden_dim)

    q_tot = qmixer_forward(
        agent_qs, state, params,
        n_agents=n_agents, input_dim=input_dim, hidden_dim=hidden_dim)
    q_tot = jax.block_until_ready(q_tot)

    ref = _reference(agent_qs, state, params, n_agents, hidden_dim)
    assert q_tot.shape == (N, L, 1)
    assert jnp.allclose(q_tot, ref, atol=1e-4, rtol=1e-4)

    print("KERNEL_OK")
</pallas_src>

<mosaic_0001>
module attributes {stable_mosaic.version = 11 : i64} {
  func.func @_qmix_kernel(%arg0: i32, %arg1: memref<8x256xf32, #tpu.memory_space<vmem>>, %arg2: memref<32x256xf32, #tpu.memory_space<vmem>>, %arg3: memref<224x32xf32, #tpu.memory_space<vmem>>, %arg4: memref<224x1xf32, #tpu.memory_space<vmem>>, %arg5: memref<128x8xf32, #tpu.memory_space<vmem>>, %arg6: memref<32x128xf32, #tpu.memory_space<vmem>>, %arg7: memref<32x1xf32, #tpu.memory_space<vmem>>, %arg8: memref<1x1xf32, #tpu.memory_space<vmem>>, %arg9: memref<1x1x256xf32, #tpu.memory_space<vmem>>) attributes {dimension_semantics = [#tpu.dimension_semantics<parallel>], iteration_bounds = array<i64: 1>, scalar_prefetch = 0 : i64, scratch_operands = 0 : i64, tpu.core_type = #tpu.core_type<tc>, window_params = [{transform_indices = @transform_0, window_bounds = array<i64: 8, 256>}, {transform_indices = @transform_1, window_bounds = array<i64: 32, 256>}, {pipeline_mode = #tpu.pipeline_mode<synchronous>, transform_indices = @transform_2, window_bounds = array<i64: 224, 32>}, {pipeline_mode = #tpu.pipeline_mode<synchronous>, transform_indices = @transform_3, window_bounds = array<i64: 224, 1>}, {pipeline_mode = #tpu.pipeline_mode<synchronous>, transform_indices = @transform_4, window_bounds = array<i64: 128, 8>}, {pipeline_mode = #tpu.pipeline_mode<synchronous>, transform_indices = @transform_5, window_bounds = array<i64: 32, 128>}, {pipeline_mode = #tpu.pipeline_mode<synchronous>, transform_indices = @transform_6, window_bounds = array<i64: 32, 1>}, {pipeline_mode = #tpu.pipeline_mode<synchronous>, transform_indices = @transform_7, window_bounds = array<i64: 1, 1>}, {transform_indices = @transform_8, window_bounds = array<i64: 1, 1, 256>}]} {
    %c0 = arith.constant 0 : index
    %c0_0 = arith.constant 0 : index
    %0 = vector.load %arg2[%c0, %c0_0] : memref<32x256xf32, #tpu.memory_space<vmem>>, vector<32x256xf32>
    %c0_1 = arith.constant 0 : index
    %c0_2 = arith.constant 0 : index
    %1 = vector.load %arg1[%c0_1, %c0_2] : memref<8x256xf32, #tpu.memory_space<vmem>>, vector<8x256xf32>
    %c0_3 = arith.constant 0 : index
    %c0_4 = arith.constant 0 : index
    %2 = vector.load %arg3[%c0_3, %c0_4] : memref<224x32xf32, #tpu.memory_space<vmem>>, vector<224x32xf32>
    %cst = arith.constant dense<0.000000e+00> : vector<224x256xf32>
    %3 = tpu.matmul %2, %0, %cst {dimension_numbers = #tpu.dot_dimension_numbers<[1], [0], [0], [1], [0, 0, 1, 1], [], []>} : vector<224x32xf32>, vector<32x256xf32>, vector<224x256xf32> -> vector<224x256xf32>
    %c0_5 = arith.constant 0 : index
    %c0_6 = arith.constant 0 : index
    %4 = vector.load %arg4[%c0_5, %c0_6] : memref<224x1xf32, #tpu.memory_space<vmem>>, vector<224x1xf32>
    %5 = vector.broadcast %4 : vector<224x1xf32> to vector<224x256xf32>
    %6 = arith.addf %3, %5 : vector<224x256xf32>
    %7 = vector.extract_strided_slice %6 {offsets = [0, 0], sizes = [128, 256], strides = [1, 1]} : vector<224x256xf32> to vector<128x256xf32>
    %8 = math.absf %7 : vector<128x256xf32>
    %9 = vector.extract_strided_slice %6 {offsets = [128, 0], sizes = [32, 256], strides = [1, 1]} : vector<224x256xf32> to vector<32x256xf32>
    %10 = vector.extract_strided_slice %6 {offsets = [160, 0], sizes = [32, 256], strides = [1, 1]} : vector<224x256xf32> to vector<32x256xf32>
    %11 = math.absf %10 : vector<32x256xf32>
    %12 = vector.extract_strided_slice %6 {offsets = [192, 0], sizes = [32, 256], strides = [1, 1]} : vector<224x256xf32> to vector<32x256xf32>
    %cst_7 = arith.constant 0.000000e+00 : f32
    %13 = vector.broadcast %cst_7 : f32 to vector<32x256xf32>
    %14 = arith.cmpf ogt, %12, %13 : vector<32x256xf32>
    %cst_8 = arith.constant 0.00999999977 : f32
    %15 = vector.broadcast %cst_8 : f32 to vector<32x256xf32>
    %16 = arith.mulf %15, %12 : vector<32x256xf32>
    %17 = arith.select %14, %12, %16 : vector<32x256xi1>, vector<32x256xf32>
    %c0_9 = arith.constant 0 : index
    %c0_10 = arith.constant 0 : index
    %18 = vector.load %arg5[%c0_9, %c0_10] : memref<128x8xf32, #tpu.memory_space<vmem>>, vector<128x8xf32>
    %cst_11 = arith.constant dense<0.000000e+00> : vector<128x256xf32>
    %19 = tpu.matmul %18, %1, %cst_11 {dimension_numbers = #tpu.dot_dimension_numbers<[1], [0], [0], [1], [0, 0, 1, 1], [], []>} : vector<128x8xf32>, vector<8x256xf32>, vector<128x256xf32> -> vector<128x256xf32>
    %c0_12 = arith.constant 0 : index
    %c0_13 = arith.constant 0 : index
    %20 = vector.load %arg6[%c0_12, %c0_13] : memref<32x128xf32, #tpu.memory_space<vmem>>, vector<32x128xf32>
    %21 = arith.mulf %19, %8 : vector<128x256xf32>
    %cst_14 = arith.constant dense<0.000000e+00> : vector<32x256xf32>
    %22 = tpu.matmul %20, %21, %cst_14 {dimension_numbers = #tpu.dot_dimension_numbers<[1], [0], [0], [1], [0, 0, 1, 1], [], []>} : vector<32x128xf32>, vector<128x256xf32>, vector<32x256xf32> -> vector<32x256xf32>
    %23 = arith.addf %9, %22 : vector<32x256xf32>
    %cst_15 = arith.constant 0.000000e+00 : f32
    %24 = vector.broadcast %cst_15 : f32 to vector<32x256xf32>
    %25 = arith.cmpf ogt, %23, %24 : vector<32x256xf32>
    %cst_16 = arith.constant 0.000000e+00 : f32
    %26 = vector.broadcast %cst_16 : f32 to vector<32x256xf32>
    %27 = arith.minimumf %23, %26 : vector<32x256xf32>
    %28 = math.exp %27 : vector<32x256xf32>
    %cst_17 = arith.constant 1.000000e+00 : f32
    %29 = vector.broadcast %cst_17 : f32 to vector<32x256xf32>
    %30 = arith.subf %28, %29 : vector<32x256xf32>
    %31 = arith.select %25, %23, %30 : vector<32x256xi1>, vector<32x256xf32>
    %32 = arith.mulf %31, %11 : vector<32x256xf32>
    %c0_18 = arith.constant 0 : index
    %c0_19 = arith.constant 0 : index
    %33 = vector.load %arg7[%c0_18, %c0_19] : memref<32x1xf32, #tpu.memory_space<vmem>>, vector<32x1xf32>
    %34 = vector.broadcast %33 : vector<32x1xf32> to vector<32x256xf32>
    %35 = arith.mulf %17, %34 : vector<32x256xf32>
    %36 = arith.addf %32, %35 : vector<32x256xf32>
    %cst_20 = arith.constant dense<0.000000e+00> : vector<256xf32>
    %37 = vector.multi_reduction <add>, %36, %cst_20 [0] : vector<32x256xf32> to vector<256xf32>
    %38 = vector.shape_cast %37 : vector<256xf32> to vector<1x256xf32>
    %c0_21 = arith.constant 0 : index
    %c0_22 = arith.constant 0 : index
    %39 = vector.load %arg8[%c0_21, %c0_22] : memref<1x1xf32, #tpu.memory_space<vmem>>, vector<1x1xf32>
    %40 = vector.broadcast %39 : vector<1x1xf32> to vector<1x256xf32>
    %41 = arith.addf %38, %40 : vector<1x256xf32>
    %c0_23 = arith.constant 0 : index
    %c0_24 = arith.constant 0 : index
    %c0_25 = arith.constant 0 : index
    %42 = vector.load %arg9[%c0_23, %c0_24, %c0_25] : memref<1x1x256xf32, #tpu.memory_space<vmem>>, vector<1x1x256xf32>
    %43 = vector.shape_cast %42 : vector<1x1x256xf32> to vector<1x256xf32>
    %44 = vector.shape_cast %41 : vector<1x256xf32> to vector<1x1x256xf32>
    tpu.vector_store %arg9[%c0_23, %c0_24, %c0_25], %44 {strides = array<i32>} : memref<1x1x256xf32, #tpu.memory_space<vmem>>, vector<1x1x256xf32>,
    return
  }
  func.func @transform_0(%arg0: i32) -> (i32, i32) {
    %c0_i32 = arith.constant 0 : i32
    %c0_i32_0 = arith.constant 0 : i32
    return %c0_i32, %arg0 : i32, i32
  }
  func.func @transform_1(%arg0: i32) -> (i32, i32) {
    %c0_i32 = arith.constant 0 : i32
    %c0_i32_0 = arith.constant 0 : i32
    return %c0_i32, %arg0 : i32, i32
  }
  func.func @transform_2(%arg0: i32) -> (i32, i32) {
    %c0_i32 = arith.constant 0 : i32
    %c0_i32_0 = arith.constant 0 : i32
    %c0_i32_1 = arith.constant 0 : i32
    return %c0_i32, %c0_i32_0 : i32, i32
  }
  func.func @transform_3(%arg0: i32) -> (i32, i32) {
    %c0_i32 = arith.constant 0 : i32
    %c0_i32_0 = arith.constant 0 : i32
    %c0_i32_1 = arith.constant 0 : i32
    return %c0_i32, %c0_i32_0 : i32, i32
  }
  func.func @transform_4(%arg0: i32) -> (i32, i32) {
    %c0_i32 = arith.constant 0 : i32
    %c0_i32_0 = arith.constant 0 : i32
    %c0_i32_1 = arith.constant 0 : i32
    return %c0_i32, %c0_i32_0 : i32, i32
  }
  func.func @transform_5(%arg0: i32) -> (i32, i32) {
    %c0_i32 = arith.constant 0 : i32
    %c0_i32_0 = arith.constant 0 : i32
    %c0_i32_1 = arith.constant 0 : i32
    return %c0_i32, %c0_i32_0 : i32, i32
  }
  func.func @transform_6(%arg0: i32) -> (i32, i32) {
    %c0_i32 = arith.constant 0 : i32
    %c0_i32_0 = arith.constant 0 : i32
    %c0_i32_1 = arith.constant 0 : i32
    return %c0_i32, %c0_i32_0 : i32, i32
  }
  func.func @transform_7(%arg0: i32) -> (i32, i32) {
    %c0_i32 = arith.constant 0 : i32
    %c0_i32_0 = arith.constant 0 : i32
    %c0_i32_1 = arith.constant 0 : i32
    return %c0_i32, %c0_i32_0 : i32, i32
  }
  func.func @transform_8(%arg0: i32) -> (i32, i32, i32) {
    %c0_i32 = arith.constant 0 : i32
    %c0_i32_0 = arith.constant 0 : i32
    %c0_i32_1 = arith.constant 0 : i32
    return %arg0, %c0_i32, %c0_i32_0 : i32, i32, i32
  }
}

</mosaic_0001>

<bundles_post_ra>
// kernel: tpu_custom_call.1
= control target key start
LH: loop header
LB: loop body
LE: loop exit
PB: predicated region body
PF: predicated region fallthrough
CT: control target
= control target key end

     0   :  { %s1928_s0 = inlined_call_operand.vmem [shape: f32[8,256], index: 0, kind: input, shape index: {}]   ;;  %s1929_s1 = inlined_call_operand.vmem [shape: f32[32,256], index: 1, kind: input, shape index: {}]   ;;  %s1930_s2 = inlined_call_operand.vmem [shape: f32[224,32], index: 2, kind: input, shape index: {}]   ;;  %s1931_s3 = inlined_call_operand.vmem [shape: f32[224,1], index: 3, kind: input, shape index: {}]   ;;  %s1932_s4 = inlined_call_operand.vmem [shape: f32[128,8], index: 4, kind: input, shape index: {}]   ;;  %s1933_s5 = inlined_call_operand.vmem [shape: f32[32,128], index: 5, kind: input, shape index: {}]   ;;  %s1934_s6 = inlined_call_operand.vmem [shape: f32[32,1], index: 6, kind: input, shape index: {}]   ;;  %s1935_s7 = inlined_call_operand.<no memory space> [shape: f32[1,1], index: 7, kind: input, shape index: {}]   ;;  %s1936_s8 = inlined_call_operand.hbm [shape: f32[1,1,256], index: 8, kind: output, shape index: {}]  }
   0x1   :  { %v13_v0 = vstv %s1935_s7 }
   0x2   :  { %14 = vst [vmem:[#allocation2] sm:$0x1] %v13_v0 }
   0x3   :  { %v33_v1 = vld [vmem:[%s1929_s1 + $0x8] sm:$0xff]  ;;  %v35_v2 = vld [vmem:[%s1929_s1 + $0x18] sm:$0xff]  ;;  %v32_v3 = vld [vmem:[%s1929_s1] sm:$0xff]  ;;  %v1300_v8 = vmov 0.0   ;;  %v1301_v13 = vmov 0   ;;  %vm238_vm0 = vcmask 261120  }
   0x4   :  { %v1194_v4 = vpack.c.bf16 %v35_v2, %v33_v1  ;;  %v34_v5 = vld [vmem:[%s1929_s1 + $0x10] sm:$0xff]  ;;  %v37_v6 = vld [vmem:[%s1929_s1 + $0x28] sm:$0xff]  ;;  %v39_v7 = vld [vmem:[%s1929_s1 + $0x38] sm:$0xff]  ;;  %387 = vmatprep.mubr.f32.mxu0 %v1300_v8  ;;  %507 = vmatprep.mubr.f32.mxu1 %v1300_v8 }
   0x5   :  { %v1196_v9 = vpack.c.bf16 %v34_v5, %v32_v3  ;;  %v1198_v10 = vpack.c.bf16 %v39_v7, %v37_v6  ;;  %v36_v11 = vld [vmem:[%s1929_s1 + $0x20] sm:$0xff]  ;;  %v38_v12 = vld [vmem:[%s1929_s1 + $0x30] sm:$0xff]  ;;  %1258 = vset.pattern.permute.xlu0 %v1301_v13  ;;  %1259 = vset.pattern.permute.xlu1 %v1301_v13  ;;  %v41_v15 = vld [vmem:[%s1928_s0 + $0x8] sm:$0xff] }
   0x6   :  { %1195 = vmatprep.subr.bf16.mxu0 %v1194_v4  ;;  %1234 = vmatprep.subr.bf16.mxu1 %v1194_v4  ;;  %v1200_v14 = vpack.c.bf16 %v38_v12, %v36_v11  ;;  %v42_v16 = vld [vmem:[%s1930_s2] sm:$0xff]  ;;  %v72_v20 = vld [vmem:[%s1931_s3 + $0x10] sm:$0xff]  ;;  %v43_v21 = vld [vmem:[%s1930_s2 + $0x8] sm:$0xff] }
   0x7   :  { %1197 = vmatpush1.bf16.msra.mxu0 %v1196_v9  ;;  %1236 = vmatpush1.bf16.msra.mxu1 %v1196_v9  ;;  %v62_v17 = vld [vmem:[%s1930_s2 + $0xa0] sm:$0xff]  ;;  %v63_v22 = vld [vmem:[%s1930_s2 + $0xa8] sm:$0xff]  ;;  %v73_v24 = vld [vmem:[%s1931_s3 + $0x18] sm:$0xff] }
   0x8   :  { %1199 = vmatprep.subr.bf16.mxu0 %v1198_v10  ;;  %1235 = vmatprep.subr.bf16.mxu1 %v1198_v10  ;;  %v40_v18 = vld [vmem:[%s1928_s0] sm:$0xff]  ;;  %v71_v23 = vld [vmem:[%s1931_s3 + $0x8] sm:$0xff]  ;;  %v44_v25 = vld [vmem:[%s1930_s2 + $0x10] sm:$0xff] }
   0x9   :  { %v70_v19 = vld [vmem:[%s1931_s3] sm:$0xff]  ;;  %110 = vperm.xlu1 %1259, %v72_v20   ;;  %v64_v26 = vld [vmem:[%s1930_s2 + $0xb0] sm:$0xff]  ;;  %v75_v28 = vld [vmem:[%s1931_s3 + $0x28] sm:$0xff] }
   0xa   :  { %100 = vperm.xlu0 %1258, %v70_v19   ;;  %v74_v27 = vld [vmem:[%s1931_s3 + $0x20] sm:$0xff]  ;;  %v45_v29 = vld [vmem:[%s1930_s2 + $0x18] sm:$0xff]  ;;  %v76_v31 = vld [vmem:[%s1931_s3 + $0x30] sm:$0xff] }
   0xb   :  { %1201 = vmatpush1.bf16.msra.mxu0 %v1200_v14  ;;  %1237 = vmatpush1.bf16.msra.mxu1 %v1200_v14  ;;  %v65_v30 = vld [vmem:[%s1930_s2 + $0xb8] sm:$0xff]  ;;  %v46_v33 = vld [vmem:[%s1930_s2 + $0x20] sm:$0xff]  ;;  %v79_v36 = vld [vmem:[%s1931_s3 + $0x48] sm:$0xff] }
   0xc   :  { %685 = vmatprep.subr.mxu1 %v41_v15  ;;  %v77_v32 = vld [vmem:[%s1931_s3 + $0x38] sm:$0xff]  ;;  %v66_v34 = vld [vmem:[%s1930_s2 + $0xc0] sm:$0xff] }
   0xd   :  { %115 = vperm.xlu1 %1259, %v73_v24   ;;  %v78_v35 = vld [vmem:[%s1931_s3 + $0x40] sm:$0xff] }
   0xe   :  { %1142 = vmatmul.mubr.msk.f32.vlgmr.msra.gmra.mrb[0].mxu0 %vm238_vm0, %v42_v16  ;;  %1162 = vmatmul.mubr.msk.f32.vlgmr.msra.gmra.mrb[0].mxu1 %vm238_vm0, %v62_v17 }
   0xf   :  { %393 = vmatprep.mubr.f32.mxu0 %v1300_v8  ;;  %513 = vmatprep.mubr.f32.mxu1 %v1300_v8 }
  0x10   :  { %686 = vmatpush1.msra.mxu1 %v40_v18  ;;  %105 = vperm.xlu0 %1258, %v71_v23  }
  0x11   :  { %125 = vperm.xlu1 %1259, %v75_v28  }
  0x12   :  { %1143 = vmatmul.mubr.msk.f32.gmra.mrb[2].mxu0 %vm238_vm0, %v43_v21  ;;  %1163 = vmatmul.mubr.msk.f32.gmra.mrb[2].mxu1 %vm238_vm0, %v63_v22 }
  0x13   :  { %399 = vmatprep.mubr.f32.mxu0 %v1300_v8  ;;  %519 = vmatprep.mubr.f32.mxu1 %v1300_v8 }
  0x14   :  { %120 = vperm.xlu0 %1258, %v74_v27  }
  0x15   :  { %135 = vperm.xlu1 %1259, %v77_v32  }
  0x16   :  { %1144 = vmatmul.mubr.msk.f32.gmra.mrb[4].mxu0 %vm238_vm0, %v44_v25  ;;  %1164 = vmatmul.mubr.msk.f32.gmra.mrb[4].mxu1 %vm238_vm0, %v64_v26 }
  0x17   :  { %405 = vmatprep.mubr.f32.mxu0 %v1300_v8  ;;  %525 = vmatprep.mubr.f32.mxu1 %v1300_v8 }
  0x18   :  { %130 = vperm.xlu0 %1258, %v76_v31  }
  0x1a   :  { %1145 = vmatmul.mubr.msk.f32.gmra.mrb[6].mxu0 %vm238_vm0, %v45_v29  ;;  %1165 = vmatmul.mubr.msk.f32.gmra.mrb[6].mxu1 %vm238_vm0, %v65_v30 }
  0x1b   :  { %411 = vmatprep.mubr.f32.mxu0 %v1300_v8  ;;  %531 = vmatprep.mubr.f32.mxu1 %v1300_v8 }
  0x1e   :  { %1146 = vmatmul.mubr.msk.f32.gmra.mrb[8].mxu0 %vm238_vm0, %v46_v33  ;;  %1166 = vmatmul.mubr.msk.f32.gmra.mrb[8].mxu1 %vm238_vm0, %v66_v34 }
  0x1f   :  { %15 = vsyncpa [#allocation4], 0  ;;  %417 = vmatprep.mubr.f32.mxu0 %v1300_v8  ;;  %537 = vmatprep.mubr.f32.mxu1 %v1300_v8  ;;  %v47_v37 = vld [vmem:[%s1930_s2 + $0x28] sm:$0xff]  ;;  %v80_v39 = vld [vmem:[%s1931_s3 + $0x50] sm:$0xff]  ;;  %vm636_vm1 = vcmask 64512  }
  0x20   :  { %v67_v38 = vld [vmem:[%s1930_s2 + $0xc8] sm:$0xff]  ;;  %140 = vperm.xlu0 %1258, %v78_v35   ;;  %145 = vperm.xlu1 %1259, %v79_v36   ;;  %v81_v40 = vld [vmem:[%s1931_s3 + $0x58] sm:$0xff]  ;;  %v48_v41 = vld [vmem:[%s1930_s2 + $0x30] sm:$0xff] }
  0x21   :  { %v68_v42 = vld [vmem:[%s1930_s2 + $0xd0] sm:$0xff]  ;;  %v82_v43 = vld [vmem:[%s1931_s3 + $0x60] sm:$0xff]  ;;  %v83_v44 = vld [vmem:[%s1931_s3 + $0x68] sm:$0xff] }
  0x22   :  { %1147 = vmatmul.mubr.msk.f32.gmra.mrb[10].mxu0 %vm238_vm0, %v47_v37  ;;  %1167 = vmatmul.mubr.msk.f32.gmra.mrb[10].mxu1 %vm238_vm0, %v67_v38  ;;  %v49_v45 = vld [vmem:[%s1930_s2 + $0x38] sm:$0xff]  ;;  %v84_v47 = vld [vmem:[%s1931_s3 + $0x70] sm:$0xff]  ;;  %v50_v49 = vld [vmem:[%s1930_s2 + $0x40] sm:$0xff] }
  0x23   :  { %423 = vmatprep.mubr.f32.mxu0 %v1300_v8  ;;  %543 = vmatprep.mubr.f32.mxu1 %v1300_v8  ;;  %v69_v46 = vld [vmem:[%s1930_s2 + $0xd8] sm:$0xff]  ;;  %v620_v50 = vld [vmem:[%s1932_s4] sm:$0xff]  ;;  %v87_v52 = vld [vmem:[%s1931_s3 + $0x88] sm:$0xff] }
  0x24   :  { %150 = vperm.xlu0 %1258, %v80_v39   ;;  %155 = vperm.xlu1 %1259, %v81_v40   ;;  %v85_v48 = vld [vmem:[%s1931_s3 + $0x78] sm:$0xff]  ;;  %v86_v51 = vld [vmem:[%s1931_s3 + $0x80] sm:$0xff]  ;;  %v51_v53 = vld [vmem:[%s1930_s2 + $0x48] sm:$0xff] }
  0x25   :  { %v621_v54 = vld [vmem:[%s1932_s4 + $0x8] sm:$0xff]  ;;  %v88_v55 = vld [vmem:[%s1931_s3 + $0x90] sm:$0xff]  ;;  %v89_v56 = vld [vmem:[%s1931_s3 + $0x98] sm:$0xff] }
  0x26   :  { %1148 = vmatmul.mubr.msk.f32.gmra.mrb[12].mxu0 %vm238_vm0, %v48_v41  ;;  %1168 = vmatmul.mubr.msk.f32.gmra.mrb[12].mxu1 %vm238_vm0, %v68_v42  ;;  %v52_v57 = vld [vmem:[%s1930_s2 + $0x50] sm:$0xff]  ;;  %v94_v59 = vld [vmem:[%s1931_s3 + $0xc0] sm:$0xff]  ;;  %v95_v60 = vld [vmem:[%s1931_s3 + $0xc8] sm:$0xff] }
  0x27   :  { %429 = vmatprep.mubr.f32.mxu0 %v1300_v8  ;;  %549 = vmatprep.mubr.f32.mxu1 %v1300_v8  ;;  %v622_v58 = vld [vmem:[%s1932_s4 + $0x10] sm:$0xff]  ;;  %v53_v61 = vld [vmem:[%s1930_s2 + $0x58] sm:$0xff]  ;;  %v90_v63 = vld [vmem:[%s1931_s3 + $0xa0] sm:$0xff] }
  0x28   :  { %160 = vperm.xlu0 %1258, %v82_v43   ;;  %165 = vperm.xlu1 %1259, %v83_v44   ;;  %v623_v62 = vld [vmem:[%s1932_s4 + $0x18] sm:$0xff]  ;;  %v91_v0 = vld [vmem:[%s1931_s3 + $0xa8] sm:$0xff]  ;;  %v54_v1 = vld [vmem:[%s1930_s2 + $0x60] sm:$0xff] }
  0x29   :  { %v624_v2 = vld [vmem:[%s1932_s4 + $0x20] sm:$0xff]  ;;  %v96_v3 = vld [vmem:[%s1931_s3 + $0xd0] sm:$0xff]  ;;  %v55_v5 = vld [vmem:[%s1930_s2 + $0x68] sm:$0xff] }
  0x2a   :  { %1149 = vmatmul.mubr.msk.f32.gmra.mrb[14].mxu0 %vm238_vm0, %v49_v45  ;;  %1169 = vmatmul.mubr.msk.f32.gmra.mrb[14].mxu1 %vm238_vm0, %v69_v46  ;;  %v92_v4 = vld [vmem:[%s1931_s3 + $0xb0] sm:$0xff]  ;;  %v625_v6 = vld [vmem:[%s1932_s4 + $0x28] sm:$0xff]  ;;  %v97_v7 = vld [vmem:[%s1931_s3 + $0xd8] sm:$0xff] }
  0x2b   :  { %435 = vmatprep.mubr.f32.mxu0 %v1300_v8  ;;  %749 = vmatprep.mubr.f32.mxu1 %v1300_v8  ;;  %v93_v9 = vld [vmem:[%s1931_s3 + $0xb8] sm:$0xff]  ;;  %v56_v10 = vld [vmem:[%s1930_s2 + $0x70] sm:$0xff]  ;;  %v1035_v12 = vld [vmem:[%s1934_s6] sm:$0xff] }
  0x2c   :  { %170 = vperm.xlu0 %1258, %v84_v47   ;;  %175 = vperm.xlu1 %1259, %v85_v48   ;;  %v626_v11 = vld [vmem:[%s1932_s4 + $0x30] sm:$0xff]  ;;  %v1036_v13 = vld [vmem:[%s1934_s6 + $0x8] sm:$0xff]  ;;  %v57_v14 = vld [vmem:[%s1930_s2 + $0x78] sm:$0xff] }
  0x2d   :  { %v627_v15 = vld [vmem:[%s1932_s4 + $0x38] sm:$0xff]  ;;  %v1037_v16 = vld [vmem:[%s1934_s6 + $0x10] sm:$0xff]  ;;  %v628_v18 = vld [vmem:[%s1932_s4 + $0x40] sm:$0xff] }
  0x2e   :  { %1150 = vmatmul.mubr.msk.f32.gmra.mrb[16].mxu0 %vm238_vm0, %v50_v49  ;;  %1170 = vmatmul.mubr.msk.f32.vlgmr.msra.gmra.mrb[16].mxu1 %vm636_vm1, %v620_v50  ;;  %v1038_v17 = vld [vmem:[%s1934_s6 + $0x18] sm:$0xff]  ;;  %v1093_v19 = vld [vmem:[#allocation2] sm:$0x1]  ;;  %v629_v20 = vld [vmem:[%s1932_s4 + $0x48] sm:$0xff] }
  0x2f   :  { %441 = vmatprep.mubr.f32.mxu0 %v1300_v8  ;;  %755 = vmatprep.mubr.f32.mxu1 %v1300_v8  ;;  %v630_v21 = vld [vmem:[%s1932_s4 + $0x50] sm:$0xff]  ;;  %v631_v22 = vld [vmem:[%s1932_s4 + $0x58] sm:$0xff]  ;;  %v632_v23 = vld [vmem:[%s1932_s4 + $0x60] sm:$0xff] }
  0x30   :  { %180 = vperm.xlu0 %1258, %v86_v51   ;;  %185 = vperm.xlu1 %1259, %v87_v52   ;;  %v633_v24 = vld [vmem:[%s1932_s4 + $0x68] sm:$0xff]  ;;  %v634_v25 = vld [vmem:[%s1932_s4 + $0x70] sm:$0xff]  ;;  %v635_v26 = vld [vmem:[%s1932_s4 + $0x78] sm:$0xff] }
  0x31   :  { %v58_v27 = vld [vmem:[%s1930_s2 + $0x80] sm:$0xff]  ;;  %v59_v28 = vld [vmem:[%s1930_s2 + $0x88] sm:$0xff]  ;;  %v60_v29 = vld [vmem:[%s1930_s2 + $0x90] sm:$0xff] }
  0x32   :  { %1151 = vmatmul.mubr.msk.f32.gmra.mrb[18].mxu0 %vm238_vm0, %v51_v53  ;;  %1171 = vmatmul.mubr.msk.f32.gmra.mrb[18].mxu1 %vm636_vm1, %v621_v54  ;;  %v61_v30 = vld [vmem:[%s1930_s2 + $0x98] sm:$0xff] }
  0x33   :  { %447 = vmatprep.mubr.f32.mxu0 %v1300_v8  ;;  %761 = vmatprep.mubr.f32.mxu1 %v1300_v8 }
  0x34   :  { %190 = vperm.xlu0 %1258, %v88_v55   ;;  %195 = vperm.xlu1 %1259, %v89_v56  }
  0x36   :  { %1152 = vmatmul.mubr.msk.f32.gmra.mrb[20].mxu0 %vm238_vm0, %v52_v57  ;;  %1172 = vmatmul.mubr.msk.f32.gmra.mrb[20].mxu1 %vm636_vm1, %v622_v58 }
  0x37   :  { %453 = vmatprep.mubr.f32.mxu0 %v1300_v8  ;;  %767 = vmatprep.mubr.f32.mxu1 %v1300_v8 }
  0x38   :  { %220 = vperm.xlu0 %1258, %v94_v59   ;;  %225 = vperm.xlu1 %1259, %v95_v60  }
  0x3a   :  { %1153 = vmatmul.mubr.msk.f32.gmra.mrb[22].mxu0 %vm238_vm0, %v53_v61  ;;  %1173 = vmatmul.mubr.msk.f32.gmra.mrb[22].mxu1 %vm636_vm1, %v623_v62 }
  0x3b   :  { %459 = vmatprep.mubr.f32.mxu0 %v1300_v8  ;;  %773 = vmatprep.mubr.f32.mxu1 %v1300_v8 }
  0x3c   :  { %200 = vperm.xlu0 %1258, %v90_v63   ;;  %205 = vperm.xlu1 %1259, %v91_v0  }
  0x3e   :  { %1154 = vmatmul.mubr.msk.f32.gmra.mrb[24].mxu0 %vm238_vm0, %v54_v1  ;;  %1174 = vmatmul.mubr.msk.f32.gmra.mrb[24].mxu1 %vm636_vm1, %v624_v2 }
  0x3f   :  { %465 = vmatprep.mubr.f32.mxu0 %v1300_v8  ;;  %779 = vmatprep.mubr.f32.mxu1 %v1300_v8 }
  0x40   :  { %230 = vperm.xlu0 %1258, %v96_v3   ;;  %210 = vperm.xlu1 %1259, %v92_v4  }
  0x42   :  { %1155 = vmatmul.mubr.msk.f32.gmra.mrb[26].mxu0 %vm238_vm0, %v55_v5  ;;  %1175 = vmatmul.mubr.msk.f32.gmra.mrb[26].mxu1 %vm636_vm1, %v625_v6 }
  0x43   :  { %471 = vmatprep.mubr.f32.mxu0 %v1300_v8  ;;  %785 = vmatprep.mubr.f32.mxu1 %v1300_v8 }
  0x44   :  { %235 = vperm.xlu0 %1258, %v97_v7   ;;  %215 = vperm.xlu1 %1259, %v93_v9  }
  0x46   :  { %1156 = vmatmul.mubr.msk.f32.gmra.mrb[28].mxu0 %vm238_vm0, %v56_v10  ;;  %1176 = vmatmul.mubr.msk.f32.gmra.mrb[28].mxu1 %vm636_vm1, %v626_v11 }
  0x47   :  { %477 = vmatprep.mubr.f32.mxu0 %v1300_v8  ;;  %791 = vmatprep.mubr.f32.mxu1 %v1300_v8 }
  0x48   :  { %1041 = vperm.xlu0 %1258, %v1035_v12   ;;  %1046 = vperm.xlu1 %1259, %v1036_v13  }
  0x4a   :  { %1157 = vmatmul.mubr.msk.f32.gmra.mrb[30].mxu0 %vm238_vm0, %v57_v14  ;;  %1177 = vmatmul.mubr.msk.f32.gmra.mrb[30].mxu1 %vm636_vm1, %v627_v15 }
  0x4b   :  { %797 = vmatprep.mubr.f32.mxu1 %v1300_v8  ;;  %483 = vmatprep.mubr.f32.mxu0 %v1300_v8 }
  0x4c   :  { %1051 = vperm.xlu0 %1258, %v1037_v16   ;;  %1056 = vperm.xlu1 %1259, %v1038_v17  }
  0x4e   :  { %1178 = vmatmul.mubr.msk.f32.gmra.mrb[32].mxu1 %vm636_vm1, %v628_v18  ;;  %1158 = vmatmul.mubr.msk.f32.gmra.mrb[32].mxu0 %vm238_vm0, %v58_v27 }
  0x4f   :  { %803 = vmatprep.mubr.f32.mxu1 %v1300_v8  ;;  %489 = vmatprep.mubr.f32.mxu0 %v1300_v8 }
  0x50   :  { %1096 = vperm.xlu0 %1258, %v1093_v19  }
  0x52   :  { %1179 = vmatmul.mubr.msk.f32.gmra.mrb[34].mxu1 %vm636_vm1, %v629_v20  ;;  %1159 = vmatmul.mubr.msk.f32.gmra.mrb[34].mxu0 %vm238_vm0, %v59_v28 }
  0x53   :  { %809 = vmatprep.mubr.f32.mxu1 %v1300_v8  ;;  %495 = vmatprep.mubr.f32.mxu0 %v1300_v8 }
  0x56   :  { %1180 = vmatmul.mubr.msk.f32.gmra.mrb[36].mxu1 %vm636_vm1, %v630_v21  ;;  %1160 = vmatmul.mubr.msk.f32.gmra.mrb[36].mxu0 %vm238_vm0, %v60_v29 }
  0x57   :  { %815 = vmatprep.mubr.f32.mxu1 %v1300_v8  ;;  %501 = vmatprep.mubr.f32.mxu0 %v1300_v8 }
  0x5a   :  { %1181 = vmatmul.mubr.msk.f32.gmra.mrb[38].mxu1 %vm636_vm1, %v631_v22  ;;  %1161 = vmatmul.mubr.msk.f32.gmra.mrb[38].mxu0 %vm238_vm0, %v61_v30 }
  0x5b   :  { %821 = vmatprep.mubr.f32.mxu1 %v1300_v8  ;;  %946 = vmatprep.mubr.f32.mxu0 %v1300_v8 }
  0x5e   :  { %1182 = vmatmul.mubr.msk.f32.gmra.mrb[40].mxu1 %vm636_vm1, %v632_v23 }
  0x5f   :  { %827 = vmatprep.mubr.f32.mxu1 %v1300_v8 }
  0x62   :  { %1183 = vmatmul.mubr.msk.f32.gmra.mrb[42].mxu1 %vm636_vm1, %v633_v24 }
  0x63   :  { %833 = vmatprep.mubr.f32.mxu1 %v1300_v8 }
  0x66   :  { %1184 = vmatmul.mubr.msk.f32.gmra.mrb[44].mxu1 %vm636_vm1, %v634_v25 }
  0x67   :  { %839 = vmatprep.mubr.f32.mxu1 %v1300_v8 }
  0x6a   :  { %1185 = vmatmul.mubr.msk.f32.gmra.mrb[46].mxu1 %vm636_vm1, %v635_v26 }
  0x88   :  { %v111_v62 = vpop.permute.xlu1 %110 }
  0x89   :  { %v101_v54 = vpop.permute.xlu0 %100 }
  0x8c   :  { %v116_v19 = vpop.permute.xlu1 %115 }
  0x8f   :  { %v106_v63 = vpop.permute.xlu0 %105 }
  0x93   :  { %v121_v30 = vpop.permute.xlu0 %120 }
  0xe1   :  { %v1699_v31 = vpop.f32.mrb[0].mxu1  ;;  %v389_v32 = vpop.f32.mrb[0].mxu0 }
  0xe2   :  { %v1701_v33 = vpop.f32.mrb[1].mxu1  ;;  %v391_v34 = vpop.f32.mrb[1].mxu0  ;;  %v390_v57 = vadd.f32 %v389_v32, %v101_v54 }
  0xe3   :  { %v392_v60 = vadd.f32 %v391_v34, %v101_v54 }
  0xe4   :  { %v556_v1 = vand.u32 2147483647, %v390_v57 }
  0xe5   :  { %v1703_v35 = vpop.f32.mrb[2].mxu1  ;;  %v395_v36 = vpop.f32.mrb[2].mxu0  ;;  %v557_v5 = vand.u32 2147483647, %v392_v60 }
  0xe6   :  { %v1705_v37 = vpop.f32.mrb[3].mxu1  ;;  %v397_v38 = vpop.f32.mrb[3].mxu0  ;;  %v396_v2 = vadd.f32 %v395_v36, %v106_v63 }
  0xe7   :  { %v398_v6 = vadd.f32 %v397_v38, %v106_v63 }
  0xe8   :  { %v558_v11 = vand.u32 2147483647, %v396_v2 }
  0xe9   :  { %v1707_v39 = vpop.f32.mrb[4].mxu1  ;;  %v401_v40 = vpop.f32.mrb[4].mxu0  ;;  %v559_v16 = vand.u32 2147483647, %v398_v6 }
  0xea   :  { %v1709_v41 = vpop.f32.mrb[5].mxu1  ;;  %v403_v42 = vpop.f32.mrb[5].mxu0  ;;  %v402_v12 = vadd.f32 %v401_v40, %v111_v62 }
  0xeb   :  { %v404_v17 = vadd.f32 %v403_v42, %v111_v62 }
  0xec   :  { %v560_v22 = vand.u32 2147483647, %v402_v12 }
  0xed   :  { %v1711_v43 = vpop.f32.mrb[6].mxu1  ;;  %v407_v44 = vpop.f32.mrb[6].mxu0  ;;  %v561_v27 = vand.u32 2147483647, %v404_v17 }
  0xee   :  { %v1713_v45 = vpop.f32.mrb[7].mxu1  ;;  %v409_v46 = vpop.f32.mrb[7].mxu0  ;;  %v408_v23 = vadd.f32 %v407_v44, %v116_v19 }
  0xef   :  { %v410_v28 = vadd.f32 %v409_v46, %v116_v19 }
  0xf0   :  { %v562_v40 = vand.u32 2147483647, %v408_v23 }
  0xf1   :  { %v1715_v47 = vpop.f32.mrb[8].mxu1  ;;  %v413_v48 = vpop.f32.mrb[8].mxu0  ;;  %v563_v44 = vand.u32 2147483647, %v410_v28 }
  0xf2   :  { %v1717_v49 = vpop.f32.mrb[9].mxu1  ;;  %v415_v50 = vpop.f32.mrb[9].mxu0  ;;  %v414_v42 = vadd.f32 %v413_v48, %v121_v30 }
  0xf3   :  { %v416_v62 = vadd.f32 %v415_v50, %v121_v30 }
  0xf5   :  { %v1719_v51 = vpop.f32.mrb[10].mxu1  ;;  %v419_v53 = vpop.f32.mrb[10].mxu0  ;;  %v565_v48 = vand.u32 2147483647, %v416_v62 }
  0xf6   :  { %v1721_v52 = vpop.f32.mrb[11].mxu1  ;;  %v421_v55 = vpop.f32.mrb[11].mxu0 }
  0xf9   :  { %v1723_v56 = vpop.f32.mrb[12].mxu1  ;;  %v1727_v59 = vpop.f32.mrb[12].mxu0 }
  0xfa   :  { %v1725_v58 = vpop.f32.mrb[13].mxu1  ;;  %v1729_v61 = vpop.f32.mrb[13].mxu0 }
  0xfd   :  { %v1731_v0 = vpop.f32.mrb[14].mxu1  ;;  %v1735_v4 = vpop.f32.mrb[14].mxu0 }
  0xfe   :  { %v1733_v3 = vpop.f32.mrb[15].mxu1  ;;  %v1737_v7 = vpop.f32.mrb[15].mxu0 }
 0x101   :  { %v1739_v9 = vpop.f32.mrb[16].mxu0  ;;  %v751_v10 = vpop.f32.mrb[16].mxu1 }
 0x102   :  { %v850_v13 = vmul.f32 %v751_v10, %v556_v1  ;;  %v1741_v14 = vpop.f32.mrb[17].mxu0  ;;  %v753_v15 = vpop.f32.mrb[17].mxu1 }
 0x103   :  { %v851_v18 = vmul.f32 %v753_v15, %v557_v5  ;;  %v126_v1 = vpop.permute.xlu1 %125  ;;  %v564_v5 = vand.u32 2147483647, %v414_v42 }
 0x104   :  { %v420_v6 = vadd.f32 %v419_v53, %v126_v1 }
 0x105   :  { %v757_v20 = vpop.f32.mrb[18].mxu1  ;;  %v1743_v21 = vpop.f32.mrb[18].mxu0 }
 0x106   :  { %v852_v24 = vmul.f32 %v757_v20, %v558_v11  ;;  %v759_v25 = vpop.f32.mrb[19].mxu1  ;;  %v1745_v26 = vpop.f32.mrb[19].mxu0  ;;  %v566_v20 = vand.u32 2147483647, %v420_v6 }
 0x107   :  { %v853_v29 = vmul.f32 %v759_v25, %v559_v16  ;;  %v131_v16 = vpop.permute.xlu0 %130 }
 0x108   :  { %v1204_v32 = vpack.c.bf16 %v852_v24, %v850_v13  ;;  %v422_v13 = vadd.f32 %v421_v55, %v126_v1  ;;  %v136_v55 = vpop.permute.xlu1 %135 }
 0x109   :  { %v1202_v34 = vpack.c.bf16 %v853_v29, %v851_v18  ;;  %v1747_v36 = vpop.f32.mrb[20].mxu0  ;;  %v763_v38 = vpop.f32.mrb[20].mxu1 }
 0x10a   :  { %v1749_v54 = vpop.f32.mrb[21].mxu0  ;;  %v854_v57 = vmul.f32 %v763_v38, %v560_v22  ;;  %v765_v60 = vpop.f32.mrb[21].mxu1  ;;  %v426_v22 = vadd.f32 %v1727_v59, %v131_v16  ;;  %v567_v25 = vand.u32 2147483647, %v422_v13 }
 0x10b   :  { %v855_v63 = vmul.f32 %v765_v60, %v561_v27  ;;  %1203 = vmatprep.subr.bf16.mxu0 %v1202_v34  ;;  %v428_v27 = vadd.f32 %v1729_v61, %v131_v16  ;;  %v432_v34 = vadd.f32 %v1735_v4, %v136_v55 }
 0x10c   :  { %1205 = vmatpush1.bf16.msra.mxu0 %v1204_v32  ;;  %v568_v32 = vand.u32 2147483647, %v426_v22 }
 0x10d   :  { %v1751_v46 = vpop.f32.mrb[22].mxu0  ;;  %v769_v2 = vpop.f32.mrb[22].mxu1  ;;  %v569_v42 = vand.u32 2147483647, %v428_v27  ;;  %v570_v1 = vand.u32 2147483647, %v432_v34 }
 0x10e   :  { %v856_v10 = vmul.f32 %v769_v2, %v562_v40  ;;  %v1753_v11 = vpop.f32.mrb[23].mxu0  ;;  %v771_v12 = vpop.f32.mrb[23].mxu1 }
 0x10f   :  { %v857_v15 = vmul.f32 %v771_v12, %v563_v44 }
 0x110   :  { %v1208_v17 = vpack.c.bf16 %v856_v10, %v854_v57  ;;  %v434_v57 = vadd.f32 %v1737_v7, %v136_v55  ;;  %v141_v10 = vpop.permute.xlu0 %140 }
 0x111   :  { %v1206_v18 = vpack.c.bf16 %v857_v15, %v855_v63  ;;  %v1755_v50 = vpop.f32.mrb[24].mxu0  ;;  %v775_v19 = vpop.f32.mrb[24].mxu1  ;;  %v440_v7 = vadd.f32 %v1741_v14, %v141_v10 }
 0x112   :  { %v858_v23 = vmul.f32 %v775_v19, %v564_v5  ;;  %v1758_v24 = vpop.f32.mrb[25].mxu0  ;;  %v777_v53 = vpop.f32.mrb[25].mxu1  ;;  %v571_v4 = vand.u32 2147483647, %v434_v57 }
 0x113   :  { %v859_v28 = vmul.f32 %v777_v53, %v565_v48  ;;  %1207 = vmatprep.subr.bf16.mxu0 %v1206_v18  ;;  %v438_v48 = vadd.f32 %v1739_v9, %v141_v10  ;;  %v146_v19 = vpop.permute.xlu1 %145 }
 0x114   :  { %1209 = vmatpush1.bf16.msra.mxu0 %v1208_v17  ;;  %v446_v27 = vadd.f32 %v1745_v26, %v146_v19 }
 0x115   :  { %v1761_v29 = vpop.f32.mrb[26].mxu0  ;;  %v781_v30 = vpop.f32.mrb[26].mxu1  ;;  %v572_v22 = vand.u32 2147483647, %v438_v48 }
 0x116   :  { %v860_v38 = vmul.f32 %v781_v30, %v566_v20  ;;  %v1764_v40 = vpop.f32.mrb[27].mxu0  ;;  %v783_v59 = vpop.f32.mrb[27].mxu1 }
 0x117   :  { %v861_v60 = vmul.f32 %v783_v59, %v567_v25  ;;  %v573_v25 = vand.u32 2147483647, %v440_v7  ;;  %v151_v30 = vpop.permute.xlu0 %150  ;;  %v575_v59 = vand.u32 2147483647, %v446_v27 }
 0x118   :  { %v1212_v44 = vpack.c.bf16 %v860_v38, %v858_v23  ;;  %v444_v23 = vadd.f32 %v1743_v21, %v146_v19  ;;  %v450_v38 = vadd.f32 %v1747_v36, %v151_v30 }
 0x119   :  { %v1210_v61 = vpack.c.bf16 %v861_v60, %v859_v28  ;;  %v1767_v62 = vpop.f32.mrb[28].mxu0  ;;  %v787_v63 = vpop.f32.mrb[28].mxu1 }
 0x11a   :  { %v862_v2 = vmul.f32 %v787_v63, %v568_v32  ;;  %v1769_v5 = vpop.f32.mrb[29].mxu0  ;;  %v789_v6 = vpop.f32.mrb[29].mxu1  ;;  %v574_v34 = vand.u32 2147483647, %v444_v23  ;;  %v576_v26 = vand.u32 2147483647, %v450_v38 }
 0x11b   :  { %v863_v12 = vmul.f32 %v789_v6, %v569_v42  ;;  %1211 = vmatprep.subr.bf16.mxu0 %v1210_v61  ;;  %v452_v42 = vadd.f32 %v1749_v54, %v151_v30  ;;  %v161_v48 = vpop.permute.xlu0 %160 }
 0x11c   :  { %1213 = vmatpush1.bf16.msra.mxu0 %v1212_v44  ;;  %v156_v44 = vpop.permute.xlu1 %155 }
 0x11d   :  { %v1773_v13 = vpop.f32.mrb[30].mxu0  ;;  %v793_v15 = vpop.f32.mrb[30].mxu1  ;;  %v456_v63 = vadd.f32 %v1751_v46, %v156_v44  ;;  %v458_v6 = vadd.f32 %v1753_v11, %v156_v44 }
 0x11e   :  { %v864_v16 = vmul.f32 %v793_v15, %v570_v1  ;;  %v1775_v17 = vpop.f32.mrb[31].mxu0  ;;  %v795_v18 = vpop.f32.mrb[31].mxu1  ;;  %v462_v15 = vadd.f32 %v1755_v50, %v161_v48 }
 0x11f   :  { %v865_v20 = vmul.f32 %v795_v18, %v571_v4  ;;  %v578_v54 = vand.u32 2147483647, %v456_v63  ;;  %v464_v18 = vadd.f32 %v1758_v24, %v161_v48  ;;  %v171_v30 = vpop.permute.xlu0 %170 }
 0x120   :  { %v1216_v53 = vpack.c.bf16 %v864_v16, %v862_v2  ;;  %v577_v2 = vand.u32 2147483647, %v452_v42  ;;  %v579_v16 = vand.u32 2147483647, %v458_v6  ;;  %v580_v11 = vand.u32 2147483647, %v462_v15 }
 0x121   :  { %v1214_v9 = vpack.c.bf16 %v865_v20, %v863_v12  ;;  %v799_v28 = vpop.f32.mrb[32].mxu1  ;;  %v581_v27 = vand.u32 2147483647, %v464_v18  ;;  %v849_v18 = vld [vmem:[%s1933_s5 + $0x18] sm:$0xff] }
 0x122   :  { %v866_v55 = vmul.f32 %v799_v28, %v572_v22  ;;  %v801_v14 = vpop.f32.mrb[33].mxu1  ;;  %v166_v22 = vpop.permute.xlu1 %165 }
 0x123   :  { %v867_v32 = vmul.f32 %v801_v14, %v573_v25  ;;  %1215 = vmatprep.subr.bf16.mxu0 %v1214_v9  ;;  %v470_v9 = vadd.f32 %v1764_v40, %v166_v22 }
 0x124   :  { %1217 = vmatpush1.bf16.msra.mxu0 %v1216_v53  ;;  %v468_v53 = vadd.f32 %v1761_v29, %v166_v22 }
 0x125   :  { %v805_v57 = vpop.f32.mrb[34].mxu1  ;;  %v583_v38 = vand.u32 2147483647, %v470_v9 }
 0x126   :  { %v868_v21 = vmul.f32 %v805_v57, %v574_v34  ;;  %v807_v60 = vpop.f32.mrb[35].mxu1  ;;  %v582_v24 = vand.u32 2147483647, %v468_v53  ;;  %v474_v34 = vadd.f32 %v1767_v62, %v171_v30 }
 0x127   :  { %v869_v61 = vmul.f32 %v807_v60, %v575_v59  ;;  %v476_v59 = vadd.f32 %v1769_v5, %v171_v30 }
 0x128   :  { %v1220_v1 = vpack.c.bf16 %v868_v21, %v866_v55  ;;  %v176_v21 = vpop.permute.xlu1 %175  ;;  %v584_v40 = vand.u32 2147483647, %v474_v34 }
 0x129   :  { %v1218_v10 = vpack.c.bf16 %v869_v61, %v867_v32  ;;  %v811_v4 = vpop.f32.mrb[36].mxu1  ;;  %v480_v44 = vadd.f32 %v1773_v13, %v176_v21  ;;  %v482_v63 = vadd.f32 %v1775_v17, %v176_v21  ;;  %v846_v13 = vld [vmem:[%s1933_s5] sm:$0xff]  ;;  %v847_v17 = vld [vmem:[%s1933_s5 + $0x8] sm:$0xff] }
 0x12a   :  { %v870_v12 = vmul.f32 %v811_v4, %v576_v26  ;;  %v813_v36 = vpop.f32.mrb[37].mxu1  ;;  %v585_v26 = vand.u32 2147483647, %v476_v59 }
 0x12b   :  { %v871_v7 = vmul.f32 %v813_v36, %v577_v2  ;;  %1219 = vmatprep.subr.bf16.mxu0 %v1218_v10  ;;  %v586_v4 = vand.u32 2147483647, %v480_v44  ;;  %v587_v5 = vand.u32 2147483647, %v482_v63 }
 0x12c   :  { %1221 = vmatpush1.bf16.msra.mxu0 %v1220_v1 }
 0x12d   :  { %v817_v19 = vpop.f32.mrb[38].mxu1 }
 0x12e   :  { %v872_v46 = vmul.f32 %v817_v19, %v578_v54  ;;  %v819_v20 = vpop.f32.mrb[39].mxu1  ;;  %v186_v19 = vpop.permute.xlu1 %185 }
 0x12f   :  { %v873_v23 = vmul.f32 %v819_v20, %v579_v16  ;;  %v848_v16 = vld [vmem:[%s1933_s5 + $0x10] sm:$0xff]  ;;  %s1303_s5 = smov [#allocation3]  }
 0x130   :  { %v1224_v25 = vpack.c.bf16 %v872_v46, %v870_v12  ;;  %v181_v46 = vpop.permute.xlu0 %180  ;;  %s1134_s30 = sshll.u32 %s1303_s5, 4  ;;  %s1135_s30 = int_to_ptr.vmem [resolvable:$true] %s1134_s30 }
 0x131   :  { %v1222_v28 = vpack.c.bf16 %v873_v23, %v871_v7  ;;  %v823_v55 = vpop.f32.mrb[40].mxu1  ;;  %s1276_s6 = scalar_lea.vmem %s1135_s30, 32  ;;  %p1281_p1 = scmp.lt.s32.totalorder %s1135_s30, %s1135_s30 }
 0x132   :  { %v874_v14 = vmul.f32 %v823_v55, %v580_v11  ;;  %v825_v50 = vpop.f32.mrb[41].mxu1  ;;  %v1806_v20 = vpop.permute.xlu1 %195  ;;  %p1277_p0 = scmp.ne.s32.totalorder %s1135_s30, %s1276_s6  ;;  %p1282_p2 = scmp.lt.s32.totalorder %s1276_s6, %s1276_s6 }
 0x133   :  { %v875_v32 = vmul.f32 %v825_v50, %v581_v27  ;;  %1223 = vmatprep.subr.bf16.mxu0 %v1222_v28 }
 0x134   :  { %1225 = vmatpush1.bf16.msra.mxu0 %v1224_v25  ;;  %v191_v22 = vpop.permute.xlu0 %190  ;;  %p1283_p3 = por %p1282_p2, %p1281_p1 }
 0x135   :  { %v829_v42 = vpop.f32.mrb[42].mxu1 }
 0x136   :  { %v876_v29 = vmul.f32 %v829_v42, %v582_v24  ;;  %v831_v57 = vpop.f32.mrb[43].mxu1  ;;  %v226_v23 = vpop.permute.xlu1 %225  ;;  %p1284_p4 = pnand %p1283_p3, %p1277_p0 }
 0x137   :  { %v877_v60 = vmul.f32 %v831_v57, %v583_v38 }
 0x138   :  { %v1228_v61 = vpack.c.bf16 %v876_v29, %v874_v14  ;;  %v221_v11 = vpop.permute.xlu0 %220 }
 0x139   :  { %v1226_v1 = vpack.c.bf16 %v877_v60, %v875_v32  ;;  %v835_v2 = vpop.f32.mrb[44].mxu1  ;;  %v536_v38 = vadd.f32 %v1717_v49, %v221_v11 }
 0x13a   :  { %v878_v6 = vmul.f32 %v835_v2, %v584_v40  ;;  %v837_v62 = vpop.f32.mrb[45].mxu1  ;;  %v206_v53 = vpop.permute.xlu1 %205 }
 0x13b   :  { %v879_v10 = vmul.f32 %v837_v62, %v585_v26  ;;  %1227 = vmatprep.subr.bf16.mxu0 %v1226_v1  ;;  %v1815_v28 = vadd.f32 %v1703_v35, %v206_v53  ;;  %v1822_v30 = vadd.f32 %v1705_v37, %v206_v53  ;;  %v605_v2 = vmul.f32 0.01, %v536_v38 }
 0x13c   :  { %1229 = vmatpush1.bf16.msra.mxu0 %v1228_v61  ;;  %v201_v25 = vpop.permute.xlu0 %200  ;;  %v540_v62 = vadd.f32 %v1719_v51, %v226_v23  ;;  %vm597_vm3 = vcmp.gt.f32.partialorder %v536_v38, 0.0 }
 0x13d   :  { %v841_v12 = vpop.f32.mrb[46].mxu1  ;;  %v1809_v27 = vadd.f32 %v1699_v31, %v201_v25  ;;  %v1812_v9 = vadd.f32 %v1701_v33, %v201_v25  ;;  %v534_v31 = vadd.f32 %v1715_v47, %v221_v11  ;;  %v590_v29 = vand.u32 2147483647, %v1815_v28 }
 0x13e   :  { %v880_v36 = vmul.f32 %v841_v12, %v586_v4  ;;  %v843_v48 = vpop.f32.mrb[47].mxu1  ;;  %v211_v32 = vpop.permute.xlu1 %210  ;;  %v591_v60 = vand.u32 2147483647, %v1822_v30  ;;  %v542_v12 = vadd.f32 %v1721_v52, %v226_v23  ;;  %vm598_vm4 = vcmp.gt.f32.partialorder %v540_v62, 0.0 }
 0x13f   :  { %v881_v7 = vmul.f32 %v843_v48, %v587_v5  ;;  %v588_v34 = vand.u32 2147483647, %v1809_v27  ;;  %v589_v35 = vand.u32 2147483647, %v1812_v9  ;;  %v1837_v47 = vadd.f32 %v1707_v39, %v211_v32 }
 0x140   :  { %v1232_v54 = vpack.c.bf16 %v880_v36, %v878_v6  ;;  %v1817_v55 = vpop.permute.xlu0 %230  ;;  %v1842_v61 = vadd.f32 %v1709_v41, %v211_v32  ;;  %v604_v49 = vmul.f32 0.01, %v534_v31  ;;  %vm596_vm2 = vcmp.gt.f32.partialorder %v534_v31, 0.0 }
 0x141   :  { %v1230_v15 = vpack.c.bf16 %v881_v7, %v879_v10  ;;  %v592_v5 = vand.u32 2147483647, %v1837_v47  ;;  %v546_v23 = vadd.f32 %v1723_v56, %v1817_v55  ;;  %vm599_vm5 = vcmp.gt.f32.partialorder %v542_v12, 0.0 }
 0x142   :  { %v216_v1 = vpop.permute.xlu1 %215  ;;  %v593_v7 = vand.u32 2147483647, %v1842_v61 }
 0x143   :  { %1231 = vmatprep.subr.bf16.mxu0 %v1230_v15  ;;  %v612_v15 = vsel %vm596_vm2, %v534_v31, %v604_v49  ;;  %v1871_v25 = vadd.f32 %v1713_v45, %v216_v1  ;;  %vm600_vm6 = vcmp.gt.f32.partialorder %v546_v23, 0.0 }
 0x144   :  { %1233 = vmatpush1.bf16.msra.mxu0 %v1232_v54  ;;  %v1844_v26 = vpop.permute.xlu0 %235  ;;  %v1857_v54 = vadd.f32 %v1711_v43, %v216_v1  ;;  %v607_v43 = vmul.f32 0.01, %v542_v12 }
 0x146   :  { %v1047_v56 = vpop.permute.xlu1 %1046 }
 0x147   :  { %947 = vmatmul.mubr.f32.vlgmr.msra.gmra.mrb[32].mxu0 %v846_v13  ;;  %v613_v13 = vsel %vm597_vm3, %v536_v38, %v605_v2 }
 0x148   :  { %952 = vmatprep.mubr.f32.mxu0 %v1300_v8  ;;  %v1042_v52 = vpop.permute.xlu0 %1041 }
 0x149   :  { %v1059_v32 = vmul.f32 %v1042_v52, %v612_v15  ;;  %v1060_v38 = vmul.f32 %v1042_v52, %v613_v13 }
 0x14b   :  { %953 = vmatmul.mubr.f32.gmra.mrb[34].mxu0 %v847_v17 }
 0x14c   :  { %958 = vmatprep.mubr.f32.mxu0 %v1300_v8 }
 0x14f   :  { %959 = vmatmul.mubr.f32.gmra.mrb[36].mxu0 %v848_v16 }
 0x150   :  { %964 = vmatprep.mubr.f32.mxu0 %v1300_v8 }
 0x153   :  { %965 = vmatmul.mubr.f32.gmra.mrb[38].mxu0 %v849_v18  ;;  %v606_v18 = vmul.f32 0.01, %v540_v62 }
 0x21a   :  { %v948_v8 = vpop.f32.mrb[32].mxu0 }
 0x21b   :  { %v1819_v14 = vadd.f32 %v948_v8, %v181_v46  ;;  %v950_v50 = vpop.f32.mrb[33].mxu0 }
 0x21c   :  { %v1824_v24 = vadd.f32 %v950_v50, %v181_v46  ;;  %v594_v50 = vand.u32 2147483647, %v1857_v54 }
 0x21d   :  { %v987_v33 = vmin.f32 %v1819_v14, 0.0  ;;  %vm979_vm7 = vcmp.gt.f32.partialorder %v1819_v14, 0.0 }
 0x21e   :  { %v988_v59 = vmin.f32 %v1824_v24, 0.0  ;;  %v954_v42 = vpop.f32.mrb[34].mxu0  ;;  %vm980_vm8 = vcmp.gt.f32.partialorder %v1824_v24, 0.0 }
 0x21f   :  { %v995_v37 = vmul.f32 1.442695, %v987_v33  ;;  %v1833_v57 = vadd.f32 %v954_v42, %v186_v19  ;;  %v956_v21 = vpop.f32.mrb[35].mxu0 }
 0x220   :  { %v997_v40 = vmul.f32 1.442695, %v988_v59  ;;  %v1839_v44 = vadd.f32 %v956_v21, %v186_v19  ;;  %v614_v59 = vsel %vm598_vm4, %v540_v62, %v606_v18  ;;  %v615_v21 = vsel %vm599_vm5, %v542_v12, %v607_v43 }
 0x221   :  { %1260 = vpow2.f32 %v995_v37  ;;  %v989_v63 = vmin.f32 %v1833_v57, 0.0  ;;  %v608_v37 = vmul.f32 0.01, %v546_v23  ;;  %v1061_v1 = vmul.f32 %v1047_v56, %v614_v59 }
 0x222   :  { %1262 = vpow2.f32 %v997_v40  ;;  %v990_v6 = vmin.f32 %v1839_v44, 0.0  ;;  %v960_v39 = vpop.f32.mrb[36].mxu0  ;;  %v552_v12 = vadd.f32 %v1731_v0, %v1844_v26  ;;  %vm981_vm10 = vcmp.gt.f32.partialorder %v1833_v57, 0.0 }
 0x223   :  { %v999_v10 = vmul.f32 1.442695, %v989_v63  ;;  %v1849_v4 = vadd.f32 %v960_v39, %v191_v22  ;;  %v962_v41 = vpop.f32.mrb[37].mxu0  ;;  %vm982_vm11 = vcmp.gt.f32.partialorder %v1839_v44, 0.0 }
 0x224   :  { %v1001_v36 = vmul.f32 1.442695, %v990_v6  ;;  %v1853_v48 = vadd.f32 %v962_v41, %v191_v22  ;;  %v616_v41 = vsel %vm600_vm6, %v546_v23, %v608_v37  ;;  %vm602_vm12 = vcmp.gt.f32.partialorder %v552_v12, 0.0 }
 0x225   :  { %1264 = vpow2.f32 %v999_v10  ;;  %v991_v51 = vmin.f32 %v1849_v4, 0.0  ;;  %v1052_v10 = vpop.permute.xlu0 %1051  ;;  %vm983_vm13 = vcmp.gt.f32.partialorder %v1849_v4, 0.0 }
 0x226   :  { %1266 = vpow2.f32 %v1001_v36  ;;  %v992_v17 = vmin.f32 %v1853_v48, 0.0  ;;  %v966_v16 = vpop.f32.mrb[38].mxu0  ;;  %vm984_vm15 = vcmp.gt.f32.partialorder %v1853_v48, 0.0 }
 0x227   :  { %v1003_v19 = vmul.f32 1.442695, %v991_v51  ;;  %v1863_v46 = vadd.f32 %v966_v16, %v1806_v20  ;;  %v968_v22 = vpop.f32.mrb[39].mxu0  ;;  %v554_v51 = vadd.f32 %v1733_v3, %v1844_v26  ;;  %v1063_v16 = vmul.f32 %v1052_v10, %v616_v41 }
 0x228   :  { %v1005_v11 = vmul.f32 1.442695, %v992_v17  ;;  %v1868_v53 = vadd.f32 %v968_v22, %v1806_v20  ;;  %v548_v20 = vadd.f32 %v1725_v58, %v1817_v55  ;;  %v610_v26 = vmul.f32 0.01, %v552_v12 }
 0x229   :  { %1268 = vpow2.f32 %v1003_v19  ;;  %v993_v8 = vmin.f32 %v1863_v46, 0.0  ;;  %v611_v19 = vmul.f32 0.01, %v554_v51  ;;  %vm603_vm14 = vcmp.gt.f32.partialorder %v554_v51, 0.0 }
 0x22a   :  { %1270 = vpow2.f32 %v1005_v11  ;;  %v994_v31 = vmin.f32 %v1868_v53, 0.0  ;;  %vm601_vm9 = vcmp.gt.f32.partialorder %v548_v20, 0.0  ;;  %v609_v58 = vmul.f32 0.01, %v548_v20 }
 0x22b   :  { %v1261_v33 = vpop.eup %1260  ;;  %v1007_v45 = vmul.f32 1.442695, %v993_v8  ;;  %v1057_v8 = vpop.permute.xlu1 %1056  ;;  %vm985_vm0 = vcmp.gt.f32.partialorder %v1863_v46, 0.0  ;;  %vm986_vm1 = vcmp.gt.f32.partialorder %v1868_v53, 0.0 }
 0x22c   :  { %v1263_v42 = vpop.eup %1262  ;;  %v1186_v40 = vadd.f32 -1.0, %v1261_v33  ;;  %v1009_v49 = vmul.f32 1.442695, %v994_v31  ;;  %v617_v0 = vsel %vm601_vm9, %v548_v20, %v609_v58  ;;  %v595_v20 = vand.u32 2147483647, %v1871_v25 }
 0x22d   :  { %v1187_v63 = vadd.f32 -1.0, %v1263_v42  ;;  %1272 = vpow2.f32 %v1007_v45 }
 0x22e   :  { %v1019_v2 = vsel %vm979_vm7, %v1819_v14, %v1186_v40  ;;  %1274 = vpow2.f32 %v1009_v49 }
 0x22f   :  { %v1265_v6 = vpop.eup %1264  ;;  %v1027_v55 = vmul.f32 %v1019_v2, %v588_v34  ;;  %v1020_v39 = vsel %vm980_vm8, %v1824_v24, %v1187_v63  ;;  %v1062_v34 = vmul.f32 %v1047_v56, %v615_v21  ;;  %v1099_v63 = vlaneseq }
 0x230   :  { %v1267_v62 = vpop.eup %1266  ;;  %v1028_v14 = vmul.f32 %v1020_v39, %v589_v35  ;;  %v1188_v36 = vadd.f32 -1.0, %v1265_v6 }
 0x231   :  { %v1067_v15 = vadd.f32 %v1059_v32, %v1027_v55  ;;  %v1189_v27 = vadd.f32 -1.0, %v1267_v62  ;;  %v618_v32 = vsel %vm602_vm12, %v552_v12, %v610_v26  ;;  %vm1125_vm2 = vcmp.lt.s32.totalorder %v1099_v63, 256 }
 0x232   :  { %v1068_v13 = vadd.f32 %v1060_v38, %v1028_v14  ;;  %v1021_v24 = vsel %vm981_vm10, %v1833_v57, %v1188_v36 }
 0x233   :  { %v1269_v17 = vpop.eup %1268  ;;  %v1029_v9 = vmul.f32 %v1021_v24, %v590_v29  ;;  %v1022_v35 = vsel %vm982_vm11, %v1839_v44, %v1189_v27  ;;  %v1064_v29 = vmul.f32 %v1052_v10, %v617_v0  ;;  %v1302_v10 = vmov 1966171168  }
 0x234   :  { %v1271_v3 = vpop.eup %1270  ;;  %v1030_v18 = vmul.f32 %v1022_v35, %v591_v60  ;;  %v1190_v52 = vadd.f32 -1.0, %v1269_v17  ;;  %v1109_v54 = vunpack.c.l.s4 %v1302_v10 }
 0x235   :  { %v1069_v57 = vadd.f32 %v1061_v1, %v1029_v9  ;;  %v1191_v22 = vadd.f32 -1.0, %v1271_v3 }
 0x236   :  { %v1070_v43 = vadd.f32 %v1062_v34, %v1030_v18  ;;  %v1023_v23 = vsel %vm983_vm13, %v1849_v4, %v1190_v52  ;;  %v619_v4 = vsel %vm603_vm14, %v554_v51, %v611_v19  ;;  %v1110_v51 = vunpack.c.0.s8 %v1109_v54 }
 0x237   :  { %v1273_v28 = vpop.eup %1272  ;;  %v1075_v44 = vadd.f32 %v1069_v57, %v1067_v15  ;;  %v1031_v11 = vmul.f32 %v1023_v23, %v592_v5  ;;  %v1024_v30 = vsel %vm984_vm15, %v1853_v48, %v1191_v22  ;;  %v1065_v48 = vmul.f32 %v1057_v8, %v618_v32 }
 0x238   :  { %v1275_v60 = vpop.eup %1274  ;;  %v1084_v31 = vadd.f32 %v1070_v43, %v1068_v13  ;;  %v1032_v33 = vmul.f32 %v1024_v30, %v593_v7  ;;  %v1192_v38 = vadd.f32 -1.0, %v1273_v28  ;;  %v1066_v7 = vmul.f32 %v1057_v8, %v619_v4 }
 0x239   :  { %v1071_v56 = vadd.f32 %v1063_v16, %v1031_v11  ;;  %v1193_v59 = vadd.f32 -1.0, %v1275_v60 }
 0x23a   :  { %v1072_v47 = vadd.f32 %v1064_v29, %v1032_v33  ;;  %v1025_v5 = vsel %vm985_vm0, %v1863_v46, %v1192_v38  ;;  %v1100_v46 = vshrl.u32 %v1099_v63, 7 }
 0x23b   :  { %v1076_v45 = vadd.f32 %v1075_v44, %v1071_v56  ;;  %v1033_v42 = vmul.f32 %v1025_v5, %v594_v50  ;;  %v1026_v61 = vsel %vm986_vm1, %v1868_v53, %v1193_v59  ;;  %v1097_v53 = vpop.permute.xlu0 %1096 }
 0x23c   :  { %v1085_v37 = vadd.f32 %v1084_v31, %v1072_v47  ;;  %v1034_v21 = vmul.f32 %v1026_v61, %v595_v20  ;;  %v1101_v50 = vsub.s32 0, %v1100_v46  ;;  %v1113_v17 = vsub.s32 %v1110_v51, %v1100_v46 }
 0x23d   :  { %v1073_v40 = vadd.f32 %v1065_v48, %v1033_v42 }
 0x23e   :  { %v1074_v49 = vadd.f32 %v1066_v7, %v1034_v21  ;;  %v1102_v15 = vrot.slane %v1097_v53, %v1101_v50 }
 0x23f   :  { %v1077_v1 = vadd.f32 %v1076_v45, %v1073_v40 }
 0x240   :  { %v1086_v25 = vadd.f32 %v1085_v37, %v1074_v49 }
 0x241   :  { %v1078_v2 = vrot.slane %v1077_v1, 4 }
 0x242   :  { %v1087_v6 = vrot.slane %v1086_v25, 4 }
 0x243   :  { %v1079_v58 = vadd.f32 %v1078_v2, %v1077_v1 }
 0x244   :  { %v1088_v55 = vadd.f32 %v1087_v6, %v1086_v25 }
 0x245   :  { %v1080_v39 = vrot.slane %v1079_v58, 2 }
 0x246   :  { %v1089_v62 = vrot.slane %v1088_v55, 2 }
 0x247   :  { %v1081_v41 = vadd.f32 %v1080_v39, %v1079_v58 }
 0x248   :  { %v1090_v12 = vadd.f32 %v1089_v62, %v1088_v55 }
 0x249   :  { %v1082_v14 = vrot.slane %v1081_v41, 1 }
 0x24a   :  { %v1091_v36 = vrot.slane %v1090_v12, 1 }
 0x24b   :  { %v1083_v27 = vadd.f32 %v1082_v14, %v1081_v41 }
 0x24c   :  { %v1092_v34 = vadd.f32 %v1091_v36, %v1090_v12 }
 0x24d   :  { %v1103_v13 = vadd.f32 %v1102_v15, %v1083_v27 }
 0x24e   :  { %v1104_v24 = vadd.f32 %v1102_v15, %v1092_v34 }
 0x250   :  { %v1107_v16 = vcombine.low %v1103_v13, %v1104_v24 }
 0x252   :  { %v1114_v0 = vrot.slane %v1107_v16, %v1113_v17 }
 0x254   :  { %v1121_v9 = vrot.slane %v1114_v0, %v1113_v17 }
 0x256   :  { %1127 = vst.msk [vmem:[#allocation3] sm:$0x3] %vm1125_vm2, %v1121_v9 }
 0x257   :  { %1287 = shalt.err (!%p1284_p4)
}
 0x258   :  { %s1288_s11 = scalar_lea.hbm %s1936_s8, 32 }
 0x259   :  { %p1289_p5 = scmp.ne.s32.totalorder %s1936_s8, %s1288_s11  ;;  %p1292_p6 = scmp.lt.u32.totalorder %s1288_s11, %s1936_s8 }
 0x25b   :  { %p1294_p7 = pnand %p1292_p6, %p1289_p5 }
 0x25d   :  { %1297 = shalt.err (!%p1294_p7)
}
 0x25e   :  { %1137 = dma.vmem_to_hbm [thread:$0]  %s1135_s30, 32, %s1936_s8, [#allocation4]  }
 0x25f   :  { %1298 = dma.done.wait [#allocation4], 32  }
 0x260   :  { %1299 = vsyncadd [#allocation4], 4294967264 }
 0x261   :  { %1141 = vsyncpa [#allocation4], 1 }

</bundles_post_ra>
